<compile_context>
chip_gen: v5e
topology: v5e:2x2
jax: 0.10.0
libtpu: 0.0.40
codegen_flags: <defaults>
</compile_context>

<pallas_src>
import math

import jax
import jax.numpy as jnp
from jax.experimental import pallas as pl
from jax.experimental.pallas import tpu as pltpu


_C1 = math.sqrt(2.0 / math.pi)   # sqrt(2/pi)
_C2 = 0.044715 * _C1             # folded: C1*(x + 0.044715*x^3) == x*(C1 + C2*x^2)

_LANE = 128


def _sublane(dtype):
    """Native sublane tile for a dtype (f32: 8, bf16/f16: 16, int8: 32)."""
    return max(8, 32 // jnp.dtype(dtype).itemsize)


def _round_up(a, b):
    return ((a + b - 1) // b) * b


def gelu_kernel(x_ref, o_ref):
    x = x_ref[...].astype(jnp.float32)
    inner = x * (_C1 + _C2 * (x * x))            # VPU: folded polynomial
    hx = 0.5 * x
    o_ref[...] = (hx + hx * jnp.tanh(inner)).astype(o_ref.dtype)   # tanh -> EUP


def gelu(x, *, max_lane=2048, target_block_bytes=4 * 1024 * 1024):
    """Elementwise tanh-GELU matching the PyTorch module. Works for any shape/dtype."""
    orig_shape = x.shape
    dtype = x.dtype
    n_elems = x.size
    if n_elems == 0:
        return x

    itemsize = jnp.dtype(dtype).itemsize
    sub = _sublane(dtype)

    # ---- choose a lane-dense 2-D view (zero-copy reshape whenever possible) ----
    k_valid = None  # valid columns if we were forced to pad the lane axis
    if x.ndim == 0:
        x2 = x.reshape(1, 1)
    elif n_elems % _LANE == 0:
        # Flatten and re-chunk into the widest lane axis (<= max_lane, multiple
        # of 128) that divides the element count: a free row-major reshape.
        w = min(max_lane, n_elems)
        w -= w % _LANE
        while w > _LANE and n_elems % w != 0:
            w -= _LANE
        x2 = x.reshape(n_elems // w, w)
    else:
        # Ragged element count: keep the original trailing dim as the lane axis.
        k = orig_shape[-1]
        x2 = x.reshape(-1, k)
        if k % _LANE != 0 and k * sub * itemsize > target_block_bytes:
            # Too wide for one full-extent lane block: pad only up to the next
            # multiple of 128 (minimal padding; rare path).
            k_valid = k
            x2 = jnp.pad(x2, ((0, 0), (0, _round_up(k, _LANE) - k)))

    M, K = x2.shape

    # ---- per-generation VMEM budget (v7x has only 64 MiB per TensorCore) ----
    try:
        vmem_cap = pltpu.get_tpu_info().vmem_capacity_bytes
    except Exception:
        vmem_cap = 64 * 1024 * 1024  # conservative fallback (v7x lower bound)
    buf_budget = min((vmem_cap * 3) // 4, 96 * 1024 * 1024)
    block_bytes = min(target_block_bytes, buf_budget // 4)   # in + out, double-buffered

    # ---- tile sizes: grow the lane axis first, then the rows ----
    if K % _LANE == 0:
        max_tk = max(_LANE, (block_bytes // (sub * itemsize)) // _LANE * _LANE)
        tk = min(K, max_tk)
    else:
        tk = K                                   # full-extent trailing dim (odd K)
    tm = max(sub, (block_bytes // max(1, tk * itemsize)) // sub * sub)
    if tm >= M:
        tm = M                                   # full-extent rows (always legal)

    # v7x has 2 TensorCores: keep >= 2 grid steps along a parallel axis when the
    # input is big enough to be worth splitting.
    if pl.cdiv(M, tm) * pl.cdiv(K, tk) < 2:
        if M >= 2 * sub:
            tm = _round_up(pl.cdiv(M, 2), sub)
        elif K >= 2 * _LANE and K % _LANE == 0:
            tk = _round_up(pl.cdiv(K, 2), _LANE)

    grid = (pl.cdiv(M, tm), pl.cdiv(K, tk))

    vmem_limit = int(min(vmem_cap,
                         max(16 * 1024 * 1024,
                             4 * tm * tk * itemsize + 4 * 1024 * 1024)))

    cost = pl.CostEstimate(
        flops=7 * M * K,                 # folded polynomial part
        transcendentals=M * K,           # one tanh per element
        bytes_accessed=2 * M * K * itemsize,
    )

    out = pl.pallas_call(
        gelu_kernel,
        out_shape=jax.ShapeDtypeStruct((M, K), dtype),
        grid_spec=pltpu.PrefetchScalarGridSpec(
            num_scalar_prefetch=0,
            grid=grid,
            in_specs=[pl.BlockSpec((tm, tk), lambda i, j: (i, j))],
            out_specs=pl.BlockSpec((tm, tk), lambda i, j: (i, j)),
        ),
        compiler_params=pltpu.CompilerParams(
            dimension_semantics=("parallel", "parallel"),
            vmem_limit_bytes=vmem_limit,
        ),
        cost_estimate=cost,
    )(x2)

    if k_valid is not None:
        out = out[:, :k_valid]
    return out.reshape(orig_shape)


def gelu_ref(x):
    xf = x.astype(jnp.float32)
    y = 0.5 * xf * (1.0 + jnp.tanh(_C1 * (xf + 0.044715 * xf * xf * xf)))
    return y.astype(x.dtype)


if __name__ == "__main__":
    key = jax.random.PRNGKey(0)
    k1, k2 = jax.random.split(key)

    # GPT FeedForward activation shape: (batch=2, seq=8, hidden=4*emb, emb=32 -> 128).
    # Exercises the flatten/re-chunk lane-dense path (2048-wide lane axis).
    x_main = jax.random.normal(k1, (2, 8, 128), dtype=jnp.float32)
    y_main = jax.block_until_ready(gelu(x_main))
    assert y_main.shape == x_main.shape
    assert jnp.allclose(y_main, gelu_ref(x_main), atol=1e-5, rtol=1e-5), "mismatch (aligned case)"

    # Non-128-divisible shape: exercises the full-extent-lane (no-pad) path.
    x_odd = jax.random.normal(k2, (3, 5, 33), dtype=jnp.float32)
    y_odd = jax.block_until_ready(gelu(x_odd))
    assert y_odd.shape == x_odd.shape
    assert jnp.allclose(y_odd, gelu_ref(x_odd), atol=1e-5, rtol=1e-5), "mismatch (odd case)"

    print("KERNEL_OK")
</pallas_src>

<mosaic_0001>
module attributes {stable_mosaic.version = 11 : i64} {
  func.func @gelu_kernel(%arg0: i32, %arg1: i32, %arg2: memref<1x1024xf32, #tpu.memory_space<vmem>>, %arg3: memref<1x1024xf32, #tpu.memory_space<vmem>>) attributes {dimension_semantics = [#tpu.dimension_semantics<parallel>, #tpu.dimension_semantics<parallel>], iteration_bounds = array<i64: 1, 2>, scalar_prefetch = 0 : i64, scratch_operands = 0 : i64, tpu.core_type = #tpu.core_type<tc>, window_params = [{transform_indices = @transform_0, window_bounds = array<i64: 1, 1024>}, {transform_indices = @transform_1, window_bounds = array<i64: 1, 1024>}]} {
    %c0 = arith.constant 0 : index
    %c0_0 = arith.constant 0 : index
    %0 = vector.load %arg2[%c0, %c0_0] : memref<1x1024xf32, #tpu.memory_space<vmem>>, vector<1x1024xf32>
    %1 = arith.mulf %0, %0 : vector<1x1024xf32>
    %cst = arith.constant 0.0356774069 : f32
    %2 = vector.broadcast %cst : f32 to vector<1x1024xf32>
    %3 = arith.mulf %2, %1 : vector<1x1024xf32>
    %cst_1 = arith.constant 0.797884583 : f32
    %4 = vector.broadcast %cst_1 : f32 to vector<1x1024xf32>
    %5 = arith.addf %4, %3 : vector<1x1024xf32>
    %6 = arith.mulf %0, %5 : vector<1x1024xf32>
    %cst_2 = arith.constant 5.000000e-01 : f32
    %7 = vector.broadcast %cst_2 : f32 to vector<1x1024xf32>
    %8 = arith.mulf %7, %0 : vector<1x1024xf32>
    %9 = math.tanh %6 : vector<1x1024xf32>
    %10 = arith.mulf %8, %9 : vector<1x1024xf32>
    %11 = arith.addf %8, %10 : vector<1x1024xf32>
    %c0_3 = arith.constant 0 : index
    %c0_4 = arith.constant 0 : index
    %12 = vector.load %arg3[%c0_3, %c0_4] : memref<1x1024xf32, #tpu.memory_space<vmem>>, vector<1x1024xf32>
    tpu.vector_store %arg3[%c0_3, %c0_4], %11 {strides = array<i32>} : memref<1x1024xf32, #tpu.memory_space<vmem>>, vector<1x1024xf32>,
    return
  }
  func.func @transform_0(%arg0: i32, %arg1: i32) -> (i32, i32) {
    %c0_i32 = arith.constant 0 : i32
    return %arg0, %arg1 : i32, i32
  }
  func.func @transform_1(%arg0: i32, %arg1: i32) -> (i32, i32) {
    %c0_i32 = arith.constant 0 : i32
    return %arg0, %arg1 : i32, i32
  }
}

</mosaic_0001>

<bundles_post_ra>
// kernel: tpu_custom_call.1
= control target key start
LH: loop header
LB: loop body
LE: loop exit
PB: predicated region body
PF: predicated region fallthrough
CT: control target
= control target key end

     0   :  { %6 = vsyncpa [#allocation3], 0  ;;  %s585_s0 = inlined_call_operand.hbm [shape: f32[1,2048], index: 0, kind: input, shape index: {}]   ;;  %s586_s1 = inlined_call_operand.hbm [shape: f32[1,2048], index: 1, kind: output, shape index: {}]  }
   0x1   :  { %8 = vsyncpa [#allocation3 + $0x1], 0 }
   0x2   :  { %9 = vsyncpa [#allocation4], 0 }
   0x3   :  { %11 = vsyncpa [#allocation4 + $0x1], 0  ;;  %s465_s6 = smov 0   ;;  %s467_s7 = smov 0  }
   0x4   :  { %s469_s8 = smov 0   ;;  %s471_s9 = smov 0  }
   0x5   :  { %s473_s10 = smov 0   ;;  %s475_s11 = smov 0  }
   0x6 LB: > { %s264_s12 = sadd.s32 4294967295, %s453_s11   ;;  %s265_s13 = sadd.s32 4294967294, %s453_s11   ;;  %s453_s11 = sphi %s475_s11, %s17_s11   ;;  %s449_s10 = sphi %s473_s10, %s595_s10   ;;  %s445_s9 = sphi %s471_s9, %s594_s9   ;;  %s441_s8 = sphi %s469_s8, %s593_s8   ;;  %s437_s7 = sphi %s467_s7, %s592_s7   ;;  %s433_s6 = sphi %s465_s6, %s591_s6  }
   0x7   : > { %s26_s14 = sadd.s32 1, %s449_s10  ;;  %s38_s15 = sadd.s32 1, %s441_s8 }
   0x8   : > { %p27_p0 = scmp.ge.s32.totalorder %s26_s14, 2  ;;  %p45_p1 = scmp.ne.s32.totalorder %s441_s8, %s437_s7 }
   0x9   : > { %p46_p2 = scmp.eq.s32.totalorder %s453_s11, 0  ;;  %p51_p3 = scmp.ne.s32.totalorder %s437_s7, %s433_s6 }
   0xa   : > { %s597_s14 = smov (%p27_p0, %s26_s14), 0  ;;  %p52_p5 = scmp.eq.s32.totalorder %s264_s12, 0 }
   0xb   : > { %p506_p4 = por %p46_p2, %p45_p1  ;;  %s34_s17 = ssub.s32 %s449_s10, %s597_s14 }
   0xc   : > { %p77_p6 = scmp.eq.s32.totalorder %s264_s12, 1  ;;  %p36_p7 = scmp.eq.s32.totalorder %s34_s17, 0 }
   0xd   : > { %p512_p8 = por %p52_p5, %p51_p3  ;;  %p83_p10 = scmp.eq.s32.totalorder %s265_s13, 1 }
   0xe   : > { %p516_p9 = por %p77_p6, %p45_p1  ;;  %p267_p12 = scmp.ge.s32.totalorder %s453_s11, 2 }
   0xf   : > { %s521_s20 = scalar_select %p36_p7, %s441_s8, %s38_s15  }
  0x10   : > { %p523_p11 = por %p83_p10, %p51_p3  ;;  %p289_p13 = scmp.lt.s32.totalorder %s453_s11, 2 }
  0x11   : > { %s103_s22 = sand.u32 1, %s441_s8   ;;  %s269_s24 = sshll.u32 %s449_s10, 3 }
  0x12   : > { %s268_s23 = sshll.u32 %s103_s22, 3  ;;  %s113_s27 = scalar_lea.hbm %s585_s0, %s269_s24 }
  0x13   : > { %s107_s28 = scalar_lea.vmem [#allocation2], %s268_s23  ;;  %s115_s30 = sshll.u32 %s113_s27, 4  ;;  %s116_s30 = int_to_ptr.hbm [resolvable:$true] %s115_s30 }
  0x14   : > { %s117_s29 = sshll.u32 %s107_s28, 4  ;;  %p282_p0 = pnand %p289_p13, %p506_p4  ;;  %s118_s29 = int_to_ptr.vmem [resolvable:$true] %s117_s29 }
  0x15   : > { %p270_p1 = scmp.ge.s32.totalorder %s453_s11, 1  ;;  %p122_p2 = scmp.lt.s32.totalorder %s453_s11, 3 }
  0x16   : > { %s104_s2 = scalar_lea.sflag [#allocation3], %s103_s22 }
  0x17   : > { %284 = dma.hbm_to_vmem [thread:$0]  (!%p282_p0), %s116_s30, 128, %s118_s29, %s104_s2  }
  0x18   : > { %p123_p3 = pnand %p270_p1, %p122_p2 }
  0x19   : > { %s539_s3 = sand.u32 (!%p123_p3), 1, %s437_s7  }
  0x1a   : > { %126 = sbr.rel (%p123_p3) target bundleno = 55 (0x37), region = 24  ;;  %s271_s4 = sshll.u32 (!%p123_p3), %s539_s3, 3 }
  0x1b   : > { %s129_s5 = scalar_lea.sflag (!%p123_p3), [#allocation3], %s539_s3  ;;  %s132_s12 = scalar_lea.vmem (!%p123_p3), [#allocation2], %s271_s4 }
  0x1f   : > { %424 = dma.done.wait (%p512_p8), %s129_s5, 128  }
  0x20   : > { %426 = vsyncadd (%p512_p8), %s129_s5, 4294967168  ;;  %v154_v0 = vld [vmem:[%s132_s12] sm:$0xff]  ;;  %s274_s13 = sshll.u32 %s445_s9, 3  ;;  %s151_s22 = scalar_lea.vmem [#allocation5], %s271_s4 }
  0x21   : > { %v155_v1 = vmul.f32 %v154_v0, %v154_v0  ;;  %v159_v5 = vmul.f32 0.5, %v154_v0  ;;  %s177_s17 = scalar_lea.hbm %s586_s1, %s274_s13  ;;  %s179_s23 = sshll.u32 %s151_s22, 4  ;;  %s180_s23 = int_to_ptr.vmem [resolvable:$true] %s179_s23 }
  0x22   : > { %s181_s18 = sshll.u32 %s177_s17, 4  ;;  %s165_s24 = scalar_lea.sflag [#allocation4], %s539_s3  ;;  %s182_s18 = int_to_ptr.hbm [resolvable:$true] %s181_s18 }
  0x23   : > { %v156_v2 = vmul.f32 0.035677407, %v155_v1  ;;  %s385_s25 = sshra.s32 %s182_s18, 4  ;;  %s391_s28 = scalar_lea.hbm %s586_s1, 16  ;;  %s386_s25 = int_to_ptr.hbm [resolvable:$true] %s385_s25 }
  0x24   : > { %s387_s26 = scalar_lea.hbm %s386_s25, 8  ;;  %p392_p7 = scmp.lt.s32.totalorder %s386_s25, %s586_s1 }
  0x25   : > { %v157_v3 = vadd.f32 0.7978846, %v156_v2  ;;  %p388_p4 = scmp.ne.s32.totalorder %s386_s25, %s387_s26  ;;  %p393_p8 = scmp.lt.s32.totalorder %s391_s28, %s387_s26 }
  0x27   : > { %v158_v4 = vmul.f32 %v157_v3, %v154_v0  ;;  %p389_p5 = pnand %p388_p4, %p516_p9  ;;  %p394_p10 = por %p393_p8, %p392_p7 }
  0x29   : > { %339 = vtanh.f32 %v158_v4  ;;  %p390_p6 = pneg %p389_p5 }
  0x2b   : > { %p395_p13 = pnand %p394_p10, %p390_p6 }
  0x2f   : > { %v340_v6 = vpop.eup %339 }
  0x30   : > { %v161_v7 = vmul.f32 %v340_v6, %v159_v5 }
  0x32   : > { %v162_v8 = vadd.f32 %v161_v7, %v159_v5 }
  0x34   : > { %163 = vst [vmem:[%s151_s22] sm:$0xff] %v162_v8 }
  0x35   : > { %398 = shalt.err (!%p395_p13)
}
  0x36   : > { %279 = dma.vmem_to_hbm [thread:$0]  (%p516_p9), %s180_s23, 128, %s182_s18, %s165_s24  }
  0x37 PF: > { %s193_s2 = sand.u32 1, %s433_s6   ;;  %p286_p0 = pnand %p267_p12, %p523_p11 }
  0x38   : > { %s194_s3 = scalar_lea.sflag [#allocation4], %s193_s2 }
  0x39   : > { %p287_p1 = pneg %p286_p0 }
  0x3b   : > { %428 = dma.done.wait (%p287_p1), %s194_s3, 128  }
  0x3c   : > { %430 = vsyncadd (%p287_p1), %s194_s3, 4294967168  ;;  %s17_s11 = sadd.s32 1, %s453_s11   ;;  %s591_s6 = smov %s437_s7 }
  0x3d   : > { %p14_p2 = scmp.ge.s32.totalorder %s17_s11, 4   ;;  %s592_s7 = smov %s441_s8 }
  0x3e   : > { %s593_s8 = smov %s521_s20  ;;  %s594_s9 = smov %s449_s10 }
  0x3f   : > { %s595_s10 = smov %s597_s14  ;;  %16 = sbr.rel (!%p14_p2) target bundleno = 6 (0x6), region = 69 }
  0x44   :  { %200 = vsyncpa [#allocation3], 1 }
  0x45   :  { %202 = vsyncpa [#allocation3 + $0x1], 1 }
  0x46   :  { %203 = vsyncpa [#allocation4], 1 }
  0x47   :  { %205 = vsyncpa [#allocation4 + $0x1], 1 }

</bundles_post_ra>
